<compile_context>
chip_gen: v7x
topology: tpu7x:2x2x1
jax: 0.10.0
libtpu: 0.0.40
codegen_flags: <defaults>
</compile_context>

<pallas_src>
import jax
import jax.numpy as jnp
from jax.experimental import pallas as pl
from jax.experimental.pallas import tpu as pltpu


def _linear_kernel(w_ref, x_ref, b_ref, o_ref):
    """out[b] = W @ x[b] + bias for every batch row in this block.

    w_ref: (C_out, C_in)    resident across the grid
    x_ref: (Nb, C_in, TM)   streamed (one contiguous HBM slab per step)
    b_ref: (C_out, 1)       resident
    o_ref: (Nb, C_out, TM)  streamed, lane-dense stores along TM
    """
    w = w_ref[...]
    b = b_ref[...]
    nb = x_ref.shape[0]
    for i in range(nb):  # Nb is small & static -> unrolled; MXU far from saturation
        acc = jnp.dot(w, x_ref[i], preferred_element_type=jnp.float32)
        o_ref[i] = (acc + b).astype(o_ref.dtype)


def _vmem_capacity_bytes():
    try:
        return int(pltpu.get_tpu_info().vmem_capacity_bytes)
    except Exception:
        return 64 << 20  # conservative (v7x-sized) fallback


def linear_pallas(x_nchw, weight, bias):
    """1x1 Conv2d forward.

    x_nchw : (N, C_in, H, W) float32
    weight : (C_out, C_in)   float32   (Conv2d (C_out, C_in, 1, 1) kernel squeezed)
    bias   : (C_out,)        float32
    returns: (N, C_out, H, W) float32
    """
    N, C_in, H, W = x_nchw.shape
    C_out = weight.shape[0]
    HW = H * W
    itemsize = 4  # float32

    x3 = x_nchw.reshape(N, C_in, HW)   # free view; HW lands on the lane axis
    b2 = bias.reshape(C_out, 1)

    # ---- generation-aware tile budget (feedback #1) -------------------------
    vmem_cap = _vmem_capacity_bytes()            # ~128 MiB v5e/v6e, ~64 MiB v7x
    tile_budget = max(16 << 20, vmem_cap // 2)   # double-buffered x+out tiles get ~half
    per_col = 2 * (C_in + C_out) * itemsize      # double-buffered bytes per spatial column
    max_cols = max(128, tile_budget // per_col)  # affordable columns per grid step

    # ---- blocking: batch-block small slabs, spatial-tile large ones ---------
    if HW <= max_cols:
        # Whole spatial extent fits in one tile; pack several batches per step so
        # one contiguous leading-axis DMA replaces several tiny ones (feedback #4).
        TM = HW
        Nb = int(max(1, min(N, max_cols // HW, 8)))  # cap unroll at 8
        grid_m = 1
    else:
        # Spatial tiling; keep TM a large multiple of 128 (>=512 when budget allows).
        TM = int(max(128, (min(HW, max_cols) // 128) * 128))
        Nb = 1
        grid_m = pl.cdiv(HW, TM)
    grid_n = pl.cdiv(N, Nb)

    # ---- guarantee >= 2 parallel steps for non-trivial work (feedback #3) ---
    # v7x shards "parallel" grid axes across its 2 TensorCores; a 1-step grid
    # leaves one idle. Only split when there is enough work to be worth it.
    work_bytes = N * (C_in + C_out) * HW * itemsize
    if grid_n * grid_m == 1 and work_bytes >= (1 << 20):
        if Nb >= 2:
            Nb = pl.cdiv(Nb, 2)
            grid_n = pl.cdiv(N, Nb)
        elif HW >= 256:
            TM = ((pl.cdiv(HW, 2) + 127) // 128) * 128
            grid_m = pl.cdiv(HW, TM)

    # ---- scoped VMEM limit (feedback #2: count the 2x exactly once) ---------
    tile_x = Nb * C_in * TM * itemsize
    tile_o = Nb * C_out * TM * itemsize
    tiles_bytes = 2 * (tile_x + tile_o)                      # 2x = double buffering
    resident_bytes = 2 * (C_in * C_out + C_out) * itemsize   # weight + bias buffers
    vmem_limit = tiles_bytes + resident_bytes + (4 << 20)    # + compiler headroom
    vmem_limit = int(min(max(vmem_limit, 16 << 20), vmem_cap - (8 << 20)))

    out3 = pl.pallas_call(
        _linear_kernel,
        out_shape=jax.ShapeDtypeStruct((N, C_out, HW), x_nchw.dtype),
        grid_spec=pltpu.PrefetchScalarGridSpec(
            num_scalar_prefetch=0,
            # grid_m innermost so consecutive steps stream sequential HBM (feedback #8)
            grid=(grid_n, grid_m),
            in_specs=[
                # Resident weight/bias (constant index_map => fetched once).
                # Single-buffering (pl.Buffered(1)) only matters for large channel
                # counts (128 B / 32 B here), so default buffering is kept.
                pl.BlockSpec((C_out, C_in), lambda n, j: (0, 0)),
                pl.BlockSpec((Nb, C_in, TM), lambda n, j: (n, 0, j)),
                pl.BlockSpec((C_out, 1), lambda n, j: (0, 0)),
            ],
            out_specs=pl.BlockSpec((Nb, C_out, TM), lambda n, j: (n, 0, j)),
        ),
        compiler_params=pltpu.CompilerParams(
            dimension_semantics=("parallel", "parallel"),
            vmem_limit_bytes=vmem_limit,
        ),
    )(weight, x3, b2)

    # Free view back to NCHW.
    return out3.reshape(N, C_out, H, W)


if __name__ == "__main__":
    # Small shapes consistent with the module: batch=2, c_in=4, c_out=8, spatial=16
    N, C_in, C_out, Hs, Ws = 2, 4, 8, 16, 16

    key = jax.random.PRNGKey(0)
    kx, kw, kb = jax.random.split(key, 3)

    x = jax.random.normal(kx, (N, C_in, Hs, Ws), dtype=jnp.float32)
    # Deterministic synthetic params (Conv2d weight shape (C_out, C_in, 1, 1) squeezed)
    bound = 1.0 / (C_in ** 0.5)
    weight = jax.random.uniform(kw, (C_out, C_in), dtype=jnp.float32,
                                minval=-bound, maxval=bound)
    bias = jax.random.uniform(kb, (C_out,), dtype=jnp.float32,
                              minval=-bound, maxval=bound)

    y = jax.block_until_ready(linear_pallas(x, weight, bias))

    # Reference check (pure JAX einsum == 1x1 conv)
    y_ref = jnp.einsum("nchw,oc->nohw", x, weight) + bias[None, :, None, None]
    assert y.shape == (N, C_out, Hs, Ws)
    assert jnp.allclose(y, y_ref, atol=1e-5, rtol=1e-5)

    print("KERNEL_OK")
</pallas_src>

<mosaic_0001>
module attributes {stable_mosaic.version = 11 : i64} {
  func.func @_linear_kernel(%arg0: i32, %arg1: i32, %arg2: memref<8x4xf32, #tpu.memory_space<vmem>>, %arg3: memref<2x4x256xf32, #tpu.memory_space<vmem>>, %arg4: memref<8x1xf32, #tpu.memory_space<vmem>>, %arg5: memref<2x8x256xf32, #tpu.memory_space<vmem>>) attributes {dimension_semantics = [#tpu.dimension_semantics<parallel>, #tpu.dimension_semantics<parallel>], iteration_bounds = array<i64: 1, 1>, scalar_prefetch = 0 : i64, scratch_operands = 0 : i64, tpu.core_type = #tpu.core_type<tc>, window_params = [{pipeline_mode = #tpu.pipeline_mode<synchronous>, transform_indices = @transform_0, window_bounds = array<i64: 8, 4>}, {transform_indices = @transform_1, window_bounds = array<i64: 2, 4, 256>}, {pipeline_mode = #tpu.pipeline_mode<synchronous>, transform_indices = @transform_2, window_bounds = array<i64: 8, 1>}, {transform_indices = @transform_3, window_bounds = array<i64: 2, 8, 256>}]} {
    %c0 = arith.constant 0 : index
    %c0_0 = arith.constant 0 : index
    %0 = vector.load %arg2[%c0, %c0_0] : memref<8x4xf32, #tpu.memory_space<vmem>>, vector<8x4xf32>
    %c0_1 = arith.constant 0 : index
    %c0_2 = arith.constant 0 : index
    %1 = vector.load %arg4[%c0_1, %c0_2] : memref<8x1xf32, #tpu.memory_space<vmem>>, vector<8x1xf32>
    %c0_3 = arith.constant 0 : index
    %c0_4 = arith.constant 0 : index
    %c0_5 = arith.constant 0 : index
    %2 = vector.load %arg3[%c0_3, %c0_4, %c0_5] : memref<2x4x256xf32, #tpu.memory_space<vmem>>, vector<1x4x256xf32>
    %3 = vector.shape_cast %2 : vector<1x4x256xf32> to vector<4x256xf32>
    %cst = arith.constant dense<0.000000e+00> : vector<8x256xf32>
    %4 = tpu.matmul %0, %3, %cst {dimension_numbers = #tpu.dot_dimension_numbers<[1], [0], [0], [1], [0, 0, 1, 1], [], []>} : vector<8x4xf32>, vector<4x256xf32>, vector<8x256xf32> -> vector<8x256xf32>
    %5 = vector.broadcast %1 : vector<8x1xf32> to vector<8x256xf32>
    %6 = arith.addf %4, %5 : vector<8x256xf32>
    %c0_6 = arith.constant 0 : index
    %c0_7 = arith.constant 0 : index
    %c0_8 = arith.constant 0 : index
    %7 = vector.load %arg5[%c0_6, %c0_7, %c0_8] : memref<2x8x256xf32, #tpu.memory_space<vmem>>, vector<1x8x256xf32>
    %8 = vector.shape_cast %7 : vector<1x8x256xf32> to vector<8x256xf32>
    %9 = vector.shape_cast %6 : vector<8x256xf32> to vector<1x8x256xf32>
    tpu.vector_store %arg5[%c0_6, %c0_7, %c0_8], %9 {strides = array<i32>} : memref<2x8x256xf32, #tpu.memory_space<vmem>>, vector<1x8x256xf32>,
    %c1 = arith.constant 1 : index
    %c0_9 = arith.constant 0 : index
    %c0_10 = arith.constant 0 : index
    %10 = vector.load %arg3[%c1, %c0_9, %c0_10] : memref<2x4x256xf32, #tpu.memory_space<vmem>>, vector<1x4x256xf32>
    %11 = vector.shape_cast %10 : vector<1x4x256xf32> to vector<4x256xf32>
    %cst_11 = arith.constant dense<0.000000e+00> : vector<8x256xf32>
    %12 = tpu.matmul %0, %11, %cst_11 {dimension_numbers = #tpu.dot_dimension_numbers<[1], [0], [0], [1], [0, 0, 1, 1], [], []>} : vector<8x4xf32>, vector<4x256xf32>, vector<8x256xf32> -> vector<8x256xf32>
    %13 = vector.broadcast %1 : vector<8x1xf32> to vector<8x256xf32>
    %14 = arith.addf %12, %13 : vector<8x256xf32>
    %c1_12 = arith.constant 1 : index
    %c0_13 = arith.constant 0 : index
    %c0_14 = arith.constant 0 : index
    %15 = vector.load %arg5[%c1_12, %c0_13, %c0_14] : memref<2x8x256xf32, #tpu.memory_space<vmem>>, vector<1x8x256xf32>
    %16 = vector.shape_cast %15 : vector<1x8x256xf32> to vector<8x256xf32>
    %17 = vector.shape_cast %14 : vector<8x256xf32> to vector<1x8x256xf32>
    tpu.vector_store %arg5[%c1_12, %c0_13, %c0_14], %17 {strides = array<i32>} : memref<2x8x256xf32, #tpu.memory_space<vmem>>, vector<1x8x256xf32>,
    return
  }
  func.func @transform_0(%arg0: i32, %arg1: i32) -> (i32, i32) {
    %c0_i32 = arith.constant 0 : i32
    %c0_i32_0 = arith.constant 0 : i32
    %c0_i32_1 = arith.constant 0 : i32
    return %c0_i32, %c0_i32_0 : i32, i32
  }
  func.func @transform_1(%arg0: i32, %arg1: i32) -> (i32, i32, i32) {
    %c0_i32 = arith.constant 0 : i32
    %c0_i32_0 = arith.constant 0 : i32
    return %arg0, %c0_i32, %arg1 : i32, i32, i32
  }
  func.func @transform_2(%arg0: i32, %arg1: i32) -> (i32, i32) {
    %c0_i32 = arith.constant 0 : i32
    %c0_i32_0 = arith.constant 0 : i32
    %c0_i32_1 = arith.constant 0 : i32
    return %c0_i32, %c0_i32_0 : i32, i32
  }
  func.func @transform_3(%arg0: i32, %arg1: i32) -> (i32, i32, i32) {
    %c0_i32 = arith.constant 0 : i32
    %c0_i32_0 = arith.constant 0 : i32
    return %arg0, %c0_i32, %arg1 : i32, i32, i32
  }
}

</mosaic_0001>

<bundles_post_ra>
// kernel: tpu_custom_call.1
= control target key start
LH: loop header
LB: loop body
LE: loop exit
PB: predicated region body
PF: predicated region fallthrough
CT: control target
= control target key end

     0   :  { %vm29_vm0 = vcmask 1043456   ;;  %v244_v4 = vmov 0.0   ;;  %s297_s0 = inlined_call_operand.vmem [shape: f32[8,4], index: 0, kind: input, shape index: {}]   ;;  %s298_s1 = inlined_call_operand.vmem [shape: f32[2,4,256], index: 1, kind: input, shape index: {}]   ;;  %s299_s2 = inlined_call_operand.vmem [shape: f32[8,1], index: 2, kind: input, shape index: {}]   ;;  %s300_s3 = inlined_call_operand.hbm [shape: f32[2,8,256], index: 3, kind: output, shape index: {}]  }
   0x1   :  { %v17_v0 = vld [vmem:[%s298_s1] sm:$0xff]  ;;  %v208_v1 = vld [vmem:[%s298_s1 + $0x8] sm:$0xff]  ;;  %98 = vmatprep.mubr.f32.mxu0 %v244_v4  ;;  %179 = vmatprep.mubr.f32.mxu1 %v244_v4 }
   0x2   :  { %v24_v2 = vcombine.high %v17_v0, %v17_v0  ;;  %v110_v3 = vcombine.high %v208_v1, %v208_v1 }
   0x3   :  { %8 = vsyncpa [#allocation3], 0  ;;  %v15_v5 = vld [vmem:[%s297_s0] sm:$0xff]  ;;  %vm25_vm1 = vcmask 31744   ;;  %v245_v6 = vmov 0   ;;  %s246_s0 = smov [#allocation2]  }
   0x4   :  { %217 = vset.pattern.permute.xlu0 %v245_v6  ;;  %205 = vmatprep.subr.msk.mxu0 %vm29_vm0, %v24_v2  ;;  %v16_v7 = vld [vmem:[%s299_s2] sm:$0xff]  ;;  %s194_s1 = sshll.u32 %s246_s0, 4  ;;  %s195_s1 = int_to_ptr.vmem [resolvable:$true] %s194_s1 }
   0x5   :  { %209 = vmatprep.subr.msk.mxu1 %vm29_vm0, %v110_v3  ;;  %206 = vmatpush1.msk.msra.mxu0 %vm29_vm0, %v17_v0  ;;  %s220_s2 = scalar_lea.vmem %s195_s1, 512  ;;  %p225_p1 = scmp.lt.s32.totalorder %s195_s1, %s195_s1 }
   0x6   :  { %210 = vmatpush1.msk.msra.mxu1 %vm29_vm0, %v208_v1  ;;  %207 = vmatmul.mubr.msk.f32.vlgmr.msra.gmra.mrb[0].mxu0 %vm25_vm1, %v15_v5  ;;  %p221_p0 = scmp.ne.s32.totalorder %s195_s1, %s220_s2  ;;  %p226_p2 = scmp.lt.s32.totalorder %s220_s2, %s220_s2 }
   0x7   :  { %211 = vmatmul.mubr.msk.f32.vlgmr.msra.gmra.mrb[0].mxu1 %vm25_vm1, %v15_v5  ;;  %20 = vperm.xlu0 %217, %v16_v7  }
   0x8   :  { %p227_p3 = por %p226_p2, %p225_p1 }
   0xa   :  { %p228_p4 = pnand %p227_p3, %p221_p0 }
  0x86   :  { %v21_v8 = vpop.permute.xlu0 %20 }
  0xd9   :  { %v100_v9 = vpop.f32.mrb[0].mxu0 }
  0xda   :  { %v181_v10 = vpop.f32.mrb[0].mxu1  ;;  %v101_v11 = vadd.f32 %v100_v9, %v21_v8  ;;  %v102_v13 = vpop.f32.mrb[1].mxu0 }
  0xdb   :  { %v182_v12 = vadd.f32 %v181_v10, %v21_v8  ;;  %v183_v14 = vpop.f32.mrb[1].mxu1  ;;  %v103_v15 = vadd.f32 %v102_v13, %v21_v8 }
  0xdc   :  { %v184_v16 = vadd.f32 %v183_v14, %v21_v8  ;;  %105 = vst [vmem:[#allocation2] sm:$0xff] %v101_v11 }
  0xdd   :  { %187 = vst [vmem:[#allocation2 + $0x10] sm:$0xff] %v182_v12  ;;  %106 = vst [vmem:[#allocation2 + $0x8] sm:$0xff] %v103_v15 }
  0xde   :  { %188 = vst [vmem:[#allocation2 + $0x18] sm:$0xff] %v184_v16 }
  0xdf   :  { %231 = shalt.err (!%p228_p4)
}
  0xe0   :  { %s232_s22 = scalar_lea.hbm %s300_s3, 512 }
  0xe1   :  { %p233_p5 = scmp.ne.s32.totalorder %s300_s3, %s232_s22  ;;  %p236_p6 = scmp.lt.u32.totalorder %s232_s22, %s300_s3 }
  0xe3   :  { %p238_p7 = pnand %p236_p6, %p233_p5 }
  0xe5   :  { %241 = shalt.err (!%p238_p7)
}
  0xe6   :  { %s247_s27 = smov 256   ;;  %s248_s28 = smov 16  }
  0xe7   :  { %200 = dma.vmem_to_hbm [thread:$0]  %s195_s1, 512, %s300_s3, [#allocation3], %s247_s27, %s247_s27, %s248_s28  }
  0xe8   :  { %242 = dma.done.wait [#allocation3], 512  }
  0xe9   :  { %243 = vsyncadd [#allocation3], 4294966784 }
  0xea   :  { %204 = vsyncpa [#allocation3], 1 }

</bundles_post_ra>
